<compile_context>
chip_gen: v7x
topology: tpu7x:2x2x1
jax: 0.10.0
libtpu: 0.0.40
codegen_flags: <defaults>
</compile_context>

<pallas_src>
import functools

import jax
import jax.numpy as jnp
from jax.experimental import pallas as pl
from jax.experimental.pallas import tpu as pltpu

LANES = 128
SUBLANES = 8
ALIGN = SUBLANES * LANES          # zero-copy threshold: flat size % 1024 == 0
WIDE_ACC_ROWS = 32                # widened resident accumulator (4 f32 vregs)


def _l1_sum_kernel(t_ref, x_ref, o_ref):
    """Accumulate sum(sigmoid(x * temperature)) along the reduction grid axis.

    t_ref : SMEM (1,) f32    scalar-prefetched temperature
    x_ref : VMEM (block_rows, 128) tile of flattened scores (native dtype)
    o_ref : VMEM (acc_rows, 128) resident partial-sum accumulator; its block
            index depends only on the parallel split, so it stays resident
            across the reduction axis.
    """
    k = pl.program_id(1)

    @pl.when(k == 0)
    def _():
        o_ref[...] = jnp.zeros_like(o_ref)

    block_rows = x_ref.shape[0]
    acc_rows = o_ref.shape[0]

    x = x_ref[...].astype(jnp.float32)
    half_t = 0.5 * t_ref[0]
    # sigmoid(z) == 0.5 * tanh(0.5 * z) + 0.5  -> one EUP push per vreg.
    vals = jnp.tanh(x * half_t) * 0.5 + 0.5
    # Fold the tile onto the resident accumulator with pure elementwise adds
    # (no cross-lane XLU work per step); final scalar reduce happens outside.
    o_ref[...] += jnp.sum(
        vals.reshape(block_rows // acc_rows, acc_rows, LANES), axis=0
    )


def _chip_tuning():
    """Return (num_splits, target_block_rows, n_input_buffers) per TPU gen."""
    kind = ""
    try:
        kind = jax.devices()[0].device_kind.lower()
    except Exception:
        pass
    if "v7" in kind:
        # 2 TensorCores/chip and much faster HBM: bigger tiles, deeper pipe.
        return 2, 2048, 3
    # v5e / v6e: single TensorCore -> no parallel split, 1024-row tiles.
    return 1, 1024, 2


def _largest_block_rows(rows, target):
    """Largest multiple of 8 that divides `rows` and is <= target."""
    start = min(target, rows)
    start -= start % SUBLANES
    for b in range(start, SUBLANES - 1, -SUBLANES):
        if rows % b == 0:
            return b
    return SUBLANES  # rows is always a multiple of 8, so unreachable


def _stream_dtype(dt):
    """Clamp the streaming dtype to a <=32-bit float (no f64/int on the VPU)."""
    dt = jnp.dtype(dt)
    if (not jnp.issubdtype(dt, jnp.floating)) or dt.itemsize > 4:
        return jnp.dtype(jnp.float32)
    return dt


def _group_partial_sum(x2, t_arr, num_splits, target_rows, n_bufs):
    """sum(sigmoid(x2 * t)) over a (rows, 128) array via one pallas_call."""
    rows = x2.shape[0]
    block_rows = _largest_block_rows(rows, target_rows)
    total_blocks = rows // block_rows
    splits = num_splits if (num_splits > 1 and total_blocks % num_splits == 0) else 1
    steps = total_blocks // splits
    acc_rows = WIDE_ACC_ROWS if block_rows % WIDE_ACC_ROWS == 0 else SUBLANES

    def in_index_map(c, k, t):            # t = prefetched temperature ref
        return (c * steps + k, 0)

    def out_index_map(c, k, t):
        return (c, 0)

    # Optional deeper input buffering (v7x only); fall back silently if the
    # installed jax version lacks the pipeline_mode kwarg.
    try:
        if n_bufs > 2:
            in_spec = pl.BlockSpec((block_rows, LANES), in_index_map,
                                   pipeline_mode=pl.Buffered(n_bufs))
        else:
            in_spec = pl.BlockSpec((block_rows, LANES), in_index_map)
    except (TypeError, AttributeError):
        in_spec = pl.BlockSpec((block_rows, LANES), in_index_map)

    n_elems = rows * LANES
    cost = pl.CostEstimate(
        flops=3 * n_elems,
        transcendentals=n_elems,
        bytes_accessed=n_elems * x2.dtype.itemsize
        + splits * acc_rows * LANES * 4,
    )

    out = pl.pallas_call(
        _l1_sum_kernel,
        out_shape=jax.ShapeDtypeStruct((splits * acc_rows, LANES), jnp.float32),
        grid_spec=pltpu.PrefetchScalarGridSpec(
            num_scalar_prefetch=1,          # temperature -> SMEM
            grid=(splits, steps),
            in_specs=[in_spec],
            out_specs=pl.BlockSpec((acc_rows, LANES), out_index_map),
        ),
        compiler_params=pltpu.CompilerParams(
            dimension_semantics=("parallel", "arbitrary"),
        ),
        cost_estimate=cost,
    )(t_arr, x2)

    # Final tiny reduction of the (splits*acc_rows, 128) partials outside.
    return jnp.sum(out)


def subnet_l1_reg_loss(named_params, temperature=1.0):
    """JAX/Pallas equivalent of SubnetL1RegLoss.forward(model, temperature).

    named_params: dict {name: array}; only names ending in 'scores' contribute.
    """
    score_params = [p for nm, p in named_params.items()
                    if nm.endswith("scores") and p.size > 0]
    if not score_params:
        return jnp.float32(0.0)

    num_splits, target_rows, n_bufs = _chip_tuning()
    t_arr = jnp.asarray(temperature, dtype=jnp.float32).reshape(1)

    partials = []
    ragged = []

    # Zero-copy path: (8*128)-aligned tensors are reshaped for free and
    # streamed directly (no concatenate, no padding, 1x HBM read).
    for p in score_params:
        flat = jnp.reshape(p, (-1,)).astype(_stream_dtype(p.dtype))
        n_i = flat.shape[0]
        if n_i % ALIGN == 0:
            rows = n_i // LANES
            # Pathological sizes (huge tensor, only tiny divisors) stream
            # faster via the padded path than via 8-row tiles.
            if rows > 4096 and _largest_block_rows(rows, target_rows) < 64:
                ragged.append(flat)
            else:
                x2 = flat.reshape(rows, LANES)
                partials.append(
                    _group_partial_sum(x2, t_arr, num_splits, target_rows, n_bufs)
                )
        else:
            ragged.append(flat)

    pad_elems = 0
    if ragged:
        dt = _stream_dtype(jnp.result_type(*ragged))
        ragged = [f.astype(dt) for f in ragged]
        n_ragged = int(sum(int(f.shape[0]) for f in ragged))
        rows = -(-n_ragged // LANES)
        rows = max(SUBLANES, -(-rows // SUBLANES) * SUBLANES)
        block_rows = min(target_rows, rows)
        rows_padded = -(-rows // block_rows) * block_rows
        pad_elems = rows_padded * LANES - n_ragged
        if pad_elems:
            # Single concatenate includes the zero padding: one small copy,
            # no mask array, no extra .at[:n].set pass.
            ragged = ragged + [jnp.zeros((pad_elems,), dtype=dt)]
        x2 = jnp.concatenate(ragged).reshape(rows_padded, LANES)
        partials.append(
            _group_partial_sum(x2, t_arr, num_splits, target_rows, n_bufs)
        )

    total = functools.reduce(jnp.add, partials)
    # Every padding element is an exact zero: sigmoid(0 * t) == 0.5, so the
    # unmasked kernel sum over-counts by exactly 0.5 per padding element.
    if pad_elems:
        total = total - jnp.float32(0.5) * pad_elems
    return total


if __name__ == "__main__":
    # Deterministic synthetic "model" parameter dict.  Mix of ragged and
    # 1024-aligned 'scores' tensors plus non-scores params that must be
    # ignored, matching the shapes a small pruning model would have.
    key = jax.random.PRNGKey(0)
    k1, k2, k3, k4, k5, k6 = jax.random.split(key, 6)
    named_params = {
        # ragged path (flat sizes 144, 512, 8 -> concatenated + padded)
        "conv1.scores": jax.random.normal(k1, (4, 4, 3, 3), dtype=jnp.float32),
        "fc1.scores": jax.random.normal(k2, (32, 16), dtype=jnp.float32),
        "fc2.bias_scores": jax.random.normal(k3, (8,), dtype=jnp.float32),
        # aligned path (flat size 2048 -> zero-copy, no concatenate)
        "fc3.scores": jax.random.normal(k4, (64, 32), dtype=jnp.float32),
        # non-'scores' params: must not contribute
        "conv1.weight": jax.random.normal(k5, (4, 4, 3, 3), dtype=jnp.float32),
        "fc1.weight": jax.random.normal(k6, (32, 16), dtype=jnp.float32),
    }
    temperature = 2.0

    loss = jax.block_until_ready(subnet_l1_reg_loss(named_params, temperature))

    # Pure-JAX reference (same semantics as the PyTorch module).
    ref = jnp.float32(0.0)
    for nm, p in named_params.items():
        if nm.endswith("scores"):
            ref = ref + jnp.sum(jax.nn.sigmoid(p.astype(jnp.float32) * temperature))

    assert jnp.allclose(loss, ref, rtol=1e-5, atol=1e-3), (loss, ref)
    print("KERNEL_OK")
</pallas_src>

<mosaic_0001>
module attributes {stable_mosaic.version = 11 : i64} {
  func.func @_l1_sum_kernel(%arg0: i32, %arg1: i32, %arg2: memref<1xf32, #tpu.memory_space<smem>>, %arg3: memref<16x128xf32, #tpu.memory_space<vmem>>, %arg4: memref<8x128xf32, #tpu.memory_space<vmem>>) attributes {dimension_semantics = [#tpu.dimension_semantics<parallel>, #tpu.dimension_semantics<arbitrary>], iteration_bounds = array<i64: 1, 1>, scalar_prefetch = 1 : i64, scratch_operands = 0 : i64, tpu.core_type = #tpu.core_type<tc>, window_params = [{transform_indices = @transform_0, window_bounds = array<i64: 16, 128>}, {transform_indices = @transform_1, window_bounds = array<i64: 8, 128>}]} {
    %c0_i32 = arith.constant 0 : i32
    %0 = arith.cmpi eq, %arg1, %c0_i32 : i32
    %1 = arith.extui %0 : i1 to i32
    %c0_i32_0 = arith.constant 0 : i32
    %2 = arith.cmpi ne, %1, %c0_i32_0 : i32
    scf.if %2 {
      %cst_10 = arith.constant 0.000000e+00 : f32
      %18 = vector.broadcast %cst_10 : f32 to vector<8x128xf32>
      %c0_11 = arith.constant 0 : index
      %c0_12 = arith.constant 0 : index
      %19 = vector.load %arg4[%c0_11, %c0_12] : memref<8x128xf32, #tpu.memory_space<vmem>>, vector<8x128xf32>
      tpu.vector_store %arg4[%c0_11, %c0_12], %18 {strides = array<i32>} : memref<8x128xf32, #tpu.memory_space<vmem>>, vector<8x128xf32>,
    } else {
    }
    %c0 = arith.constant 0 : index
    %c0_1 = arith.constant 0 : index
    %3 = vector.load %arg3[%c0, %c0_1] : memref<16x128xf32, #tpu.memory_space<vmem>>, vector<16x128xf32>
    %c0_2 = arith.constant 0 : index
    %4 = memref.load %arg2[%c0_2] : memref<1xf32, #tpu.memory_space<smem>>
    %cst = arith.constant 5.000000e-01 : f32
    %5 = arith.mulf %cst, %4 : f32
    %6 = vector.broadcast %5 : f32 to vector<16x128xf32>
    %7 = arith.mulf %3, %6 : vector<16x128xf32>
    %8 = math.tanh %7 : vector<16x128xf32>
    %cst_3 = arith.constant 5.000000e-01 : f32
    %9 = vector.broadcast %cst_3 : f32 to vector<16x128xf32>
    %10 = arith.mulf %8, %9 : vector<16x128xf32>
    %cst_4 = arith.constant 5.000000e-01 : f32
    %11 = vector.broadcast %cst_4 : f32 to vector<16x128xf32>
    %12 = arith.addf %10, %11 : vector<16x128xf32>
    %c0_5 = arith.constant 0 : index
    %c0_6 = arith.constant 0 : index
    %13 = vector.load %arg4[%c0_5, %c0_6] : memref<8x128xf32, #tpu.memory_space<vmem>>, vector<8x128xf32>
    %14 = vector.shape_cast %12 : vector<16x128xf32> to vector<2x8x128xf32>
    %cst_7 = arith.constant dense<0.000000e+00> : vector<8x128xf32>
    %15 = vector.multi_reduction <add>, %14, %cst_7 [0] : vector<2x8x128xf32> to vector<8x128xf32>
    %16 = arith.addf %13, %15 : vector<8x128xf32>
    %c0_8 = arith.constant 0 : index
    %c0_9 = arith.constant 0 : index
    %17 = vector.load %arg4[%c0_8, %c0_9] : memref<8x128xf32, #tpu.memory_space<vmem>>, vector<8x128xf32>
    tpu.vector_store %arg4[%c0_8, %c0_9], %16 {strides = array<i32>} : memref<8x128xf32, #tpu.memory_space<vmem>>, vector<8x128xf32>,
    return
  }
  func.func @transform_0(%arg0: i32, %arg1: i32, %arg2: memref<1xf32, #tpu.memory_space<smem>>) -> (i32, i32) {
    %c1_i32 = arith.constant 1 : i32
    %0 = arith.muli %arg0, %c1_i32 : i32
    %1 = arith.addi %0, %arg1 : i32
    %c0_i32 = arith.constant 0 : i32
    %c0_i32_0 = arith.constant 0 : i32
    return %1, %c0_i32 : i32, i32
  }
  func.func @transform_1(%arg0: i32, %arg1: i32, %arg2: memref<1xf32, #tpu.memory_space<smem>>) -> (i32, i32) {
    %c0_i32 = arith.constant 0 : i32
    %c0_i32_0 = arith.constant 0 : i32
    return %arg0, %c0_i32 : i32, i32
  }
}

</mosaic_0001>

<bundles_post_ra>
// kernel: tpu_custom_call.1
= control target key start
LH: loop header
LB: loop body
LE: loop exit
PB: predicated region body
PF: predicated region fallthrough
CT: control target
= control target key end

     0   :  { %8 = vsyncpa [#allocation5], 0  ;;  %s171_s0 = inlined_call_operand.<no memory space> [shape: f32[1], index: 0, kind: input, shape index: {}]   ;;  %s172_s1 = inlined_call_operand.hbm [shape: f32[16,128], index: 1, kind: input, shape index: {}]   ;;  %s173_s2 = inlined_call_operand.hbm [shape: f32[8,128], index: 2, kind: output, shape index: {}]  }
   0x1   :  { %9 = vsyncpa [#allocation6], 0  ;;  %s125_s9 = smov [#allocation4]   ;;  %s77_s13 = scalar_lea.hbm %s172_s1, 256 }
   0x2   :  { %s19_s10 = sshll.u32 %s125_s9, 4  ;;  %p78_p0 = scmp.ne.s32.totalorder %s172_s1, %s77_s13  ;;  %s20_s10 = int_to_ptr.vmem [resolvable:$true] %s19_s10 }
   0x3   :  { %p81_p1 = scmp.lt.u32.totalorder %s77_s13, %s172_s1 }
   0x5   :  { %p83_p2 = pnand %p81_p1, %p78_p0 }
   0x7   :  { %86 = shalt.err (!%p83_p2)
}
   0x8   :  { %s87_s18 = scalar_lea.vmem %s20_s10, 256  ;;  %p92_p4 = scmp.lt.s32.totalorder %s20_s10, %s20_s10 }
   0x9   :  { %p88_p3 = scmp.ne.s32.totalorder %s20_s10, %s87_s18  ;;  %p93_p5 = scmp.lt.s32.totalorder %s87_s18, %s87_s18 }
   0xb   :  { %p94_p6 = por %p93_p5, %p92_p4 }
   0xd   :  { %p95_p7 = pnand %p94_p6, %p88_p3 }
   0xf   :  { %98 = shalt.err (!%p95_p7)
}
  0x10   :  { %s126_s19 = smov 128   ;;  %s127_s20 = smov 8  }
  0x11   :  { %25 = dma.hbm_to_vmem [thread:$0]  %s172_s1, 256, %s20_s10, [#allocation5], %s126_s19, %s126_s19, %s127_s20  }
  0x12   :  { %121 = dma.done.wait [#allocation5], 256  }
  0x13   :  { %122 = vsyncadd [#allocation5], 4294967040  ;;  %s39_s25 = smul.f32 0.5, %s171_s0  ;;  %v36_v1 = vld [vmem:[#allocation4] sm:$0xff]  ;;  %v37_v2 = vld [vmem:[#allocation4 + $0x8] sm:$0xff]  ;;  %s128_s1 = smov [#allocation7]  }
  0x14   :  { %s59_s26 = sshll.u32 %s128_s1, 4  ;;  %s60_s26 = int_to_ptr.vmem [resolvable:$true] %s59_s26 }
  0x15   :  { %v40_v0 = vstv %s39_s25  ;;  %s99_s27 = scalar_lea.vmem %s60_s26, 128  ;;  %p104_p9 = scmp.lt.s32.totalorder %s60_s26, %s60_s26 }
  0x16   :  { %v41_v3 = vmul.f32 %v40_v0, %v36_v1  ;;  %v42_v4 = vmul.f32 %v40_v0, %v37_v2  ;;  %p100_p8 = scmp.ne.s32.totalorder %s60_s26, %s99_s27  ;;  %p105_p10 = scmp.lt.s32.totalorder %s99_s27, %s99_s27 }
  0x18   :  { %73 = vtanh.f32 %v41_v3  ;;  %p106_p11 = por %p105_p10, %p104_p9 }
  0x19   :  { %75 = vtanh.f32 %v42_v4 }
  0x1a   :  { %p107_p12 = pnand %p106_p11, %p100_p8 }
  0x22   :  { %v74_v5 = vpop.eup %73 }
  0x23   :  { %v76_v6 = vpop.eup %75  ;;  %v45_v7 = vmul.f32 0.5, %v74_v5 }
  0x24   :  { %v46_v8 = vmul.f32 0.5, %v76_v6 }
  0x25   :  { %v47_v9 = vadd.f32 0.5, %v45_v7 }
  0x26   :  { %v48_v10 = vadd.f32 0.5, %v46_v8 }
  0x28   :  { %v50_v11 = vadd.f32 %v48_v10, %v47_v9 }
  0x2a   :  { %52 = vst [vmem:[#allocation7] sm:$0xff] %v50_v11 }
  0x2b   :  { %110 = shalt.err (!%p107_p12)
}
  0x2c   :  { %s111_s29 = scalar_lea.hbm %s173_s2, 128 }
  0x2d   :  { %p112_p13 = scmp.ne.s32.totalorder %s173_s2, %s111_s29  ;;  %p115_p0 = scmp.lt.u32.totalorder %s111_s29, %s173_s2 }
  0x2f   :  { %p117_p1 = pnand %p115_p0, %p112_p13 }
  0x31   :  { %120 = shalt.err (!%p117_p1)
}
  0x32   :  { %62 = dma.vmem_to_hbm [thread:$0]  %s60_s26, 128, %s173_s2, [#allocation6]  }
  0x33   :  { %123 = dma.done.wait [#allocation6], 128  }
  0x34   :  { %124 = vsyncadd [#allocation6], 4294967168 }
  0x35   :  { %66 = vsyncpa [#allocation5], 1 }
  0x36   :  { %67 = vsyncpa [#allocation6], 1 }

</bundles_post_ra>
